<compile_context>
chip_gen: v6e
topology: v6e:2x2x1
jax: 0.10.0
libtpu: 0.0.40
codegen_flags: <defaults>
</compile_context>

<pallas_src>
import jax
import jax.numpy as jnp
from jax.experimental import pallas as pl
from jax.experimental.pallas import tpu as pltpu

EPS = 1e-6  # matches the PyTorch module


# ------------------------------- Pallas kernel -------------------------------

def _grn_kernel(x_ref, g_ref, b_ref, o_ref):
    # One grid step == one sample.
    #   x block : (1, C, S)  -- S = D*H*W in lanes (fully dense), C in sublanes.
    #   g, b    : (C, 1)
    #   out     : (1, C, S)
    x = x_ref[0].astype(jnp.float32)                        # (C, S)

    # L2 norm over all spatial positions, per channel (lane reduce -> XLU).
    gx = jnp.sqrt(jnp.sum(x * x, axis=-1, keepdims=True))   # (C, 1)
    # Mean of the per-channel norms over channels (sublane reduce).
    gmean = jnp.mean(gx, axis=0, keepdims=True)             # (1, 1)
    nx = gx * pl.reciprocal(gmean + EPS)                    # (C, 1), exact recip (EUP)

    g = g_ref[...].astype(jnp.float32)                      # (C, 1)
    b = b_ref[...].astype(jnp.float32)                      # (C, 1)
    y = g * (x * nx) + b + x                                # broadcast over lanes
    o_ref[0] = y.astype(o_ref.dtype)


# ------------------------------- wrapper --------------------------------------

def grn(x, gamma, beta):
    """GRN forward, matching the PyTorch module.

    x     : (N, D, H, W, C) channels-last (same layout the PyTorch module expects).
    gamma : broadcastable to (1, 1, 1, 1, C)
    beta  : broadcastable to (1, 1, 1, 1, C)
    """
    N, D, H, W, C = x.shape
    S = D * H * W
    # Layout plumbing only: present a lane-dense (C, S) slab per sample.
    xt = jnp.transpose(x.reshape(N, S, C), (0, 2, 1))       # (N, C, S)
    g = jnp.asarray(gamma, x.dtype).reshape(C, 1)
    b = jnp.asarray(beta, x.dtype).reshape(C, 1)

    # TODO(synk): for very large volumes (whole-sample C*S block no longer fits
    # VMEM, esp. v7x's 64 MiB) slab-tile S with a two-pass sum-of-squares
    # reduction; unnecessary at these sizes.

    itemsize = jnp.dtype(x.dtype).itemsize
    cost = pl.CostEstimate(
        flops=6 * N * C * S,
        transcendentals=N * C,
        bytes_accessed=(2 * N * C * S + 2 * C) * itemsize,
    )

    out = pl.pallas_call(
        _grn_kernel,
        out_shape=jax.ShapeDtypeStruct((N, C, S), x.dtype),
        grid=(N,),
        in_specs=[
            pl.BlockSpec((1, C, S), lambda n: (n, 0, 0)),
            pl.BlockSpec((C, 1), lambda n: (0, 0)),
            pl.BlockSpec((C, 1), lambda n: (0, 0)),
        ],
        out_specs=pl.BlockSpec((1, C, S), lambda n: (n, 0, 0)),
        compiler_params=pltpu.CompilerParams(
            dimension_semantics=("parallel",)),
        cost_estimate=cost,
    )(xt, g, b)

    return jnp.transpose(out, (0, 2, 1)).reshape(N, D, H, W, C)


# ------------------------------- pure-JAX reference ---------------------------

def grn_ref(x, gamma, beta):
    xf = x.astype(jnp.float32)
    gx = jnp.sqrt(jnp.sum(xf * xf, axis=(1, 2, 3), keepdims=True))   # (N,1,1,1,C)
    nx = gx / (jnp.mean(gx, axis=-1, keepdims=True) + EPS)
    return (gamma * (xf * nx) + beta + xf).astype(x.dtype)


# ----------------------------------- main --------------------------------------

if __name__ == "__main__":
    key = jax.random.PRNGKey(0)
    kx, kg, kb = jax.random.split(key, 3)

    N, D, H, W, C = 2, 8, 8, 8, 32
    x = jax.random.normal(kx, (N, D, H, W, C), jnp.float32)

    # The module initializes gamma/beta to zeros (output == x); use non-zero
    # values here so the full GRN path is actually exercised and checked.
    gamma = 0.1 * jax.random.normal(kg, (1, 1, 1, 1, C), jnp.float32)
    beta = 0.1 * jax.random.normal(kb, (1, 1, 1, 1, C), jnp.float32)

    out = grn(x, gamma, beta)
    jax.block_until_ready(out)
    assert out.shape == x.shape

    ref = grn_ref(x, gamma, beta)
    assert jnp.allclose(out, ref, atol=1e-5, rtol=1e-5), float(
        jnp.max(jnp.abs(out - ref)))

    # Default (zero) parameters, as in the PyTorch module init -> identity.
    zeros = jnp.zeros((1, 1, 1, 1, C), jnp.float32)
    out0 = grn(x, zeros, zeros)
    jax.block_until_ready(out0)
    assert jnp.allclose(out0, x, atol=1e-6)

    print("KERNEL_OK")
</pallas_src>

<mosaic_0001>
module attributes {stable_mosaic.version = 11 : i64} {
  func.func @_grn_kernel(%arg0: i32, %arg1: memref<1x32x512xf32, #tpu.memory_space<vmem>>, %arg2: memref<32x1xf32, #tpu.memory_space<vmem>>, %arg3: memref<32x1xf32, #tpu.memory_space<vmem>>, %arg4: memref<1x32x512xf32, #tpu.memory_space<vmem>>) attributes {dimension_semantics = [#tpu.dimension_semantics<parallel>], iteration_bounds = array<i64: 2>, scalar_prefetch = 0 : i64, scratch_operands = 0 : i64, tpu.core_type = #tpu.core_type<tc>, window_params = [{transform_indices = @transform_0, window_bounds = array<i64: 1, 32, 512>}, {pipeline_mode = #tpu.pipeline_mode<synchronous>, transform_indices = @transform_1, window_bounds = array<i64: 32, 1>}, {pipeline_mode = #tpu.pipeline_mode<synchronous>, transform_indices = @transform_2, window_bounds = array<i64: 32, 1>}, {transform_indices = @transform_3, window_bounds = array<i64: 1, 32, 512>}]} {
    %c0 = arith.constant 0 : index
    %c0_0 = arith.constant 0 : index
    %c0_1 = arith.constant 0 : index
    %0 = vector.load %arg1[%c0, %c0_0, %c0_1] : memref<1x32x512xf32, #tpu.memory_space<vmem>>, vector<1x32x512xf32>
    %1 = vector.shape_cast %0 : vector<1x32x512xf32> to vector<32x512xf32>
    %2 = arith.mulf %1, %1 : vector<32x512xf32>
    %cst = arith.constant dense<0.000000e+00> : vector<32xf32>
    %3 = vector.multi_reduction <add>, %2, %cst [1] : vector<32x512xf32> to vector<32xf32>
    %4 = vector.shape_cast %3 : vector<32xf32> to vector<32x1xf32>
    %5 = math.sqrt %4 : vector<32x1xf32>
    %cst_2 = arith.constant dense<0.000000e+00> : vector<1xf32>
    %6 = vector.multi_reduction <add>, %5, %cst_2 [0] : vector<32x1xf32> to vector<1xf32>
    %7 = vector.shape_cast %6 : vector<1xf32> to vector<1x1xf32>
    %cst_3 = arith.constant 3.200000e+01 : f32
    %8 = vector.broadcast %cst_3 : f32 to vector<1x1xf32>
    %9 = arith.divf %7, %8 : vector<1x1xf32>
    %cst_4 = arith.constant 9.99999997E-7 : f32
    %10 = vector.broadcast %cst_4 : f32 to vector<1x1xf32>
    %11 = arith.addf %9, %10 : vector<1x1xf32>
    %12 = tpu.reciprocal %11 : vector<1x1xf32> -> vector<1x1xf32>
    %13 = vector.broadcast %12 : vector<1x1xf32> to vector<32x1xf32>
    %14 = arith.mulf %5, %13 : vector<32x1xf32>
    %c0_5 = arith.constant 0 : index
    %c0_6 = arith.constant 0 : index
    %15 = vector.load %arg2[%c0_5, %c0_6] : memref<32x1xf32, #tpu.memory_space<vmem>>, vector<32x1xf32>
    %c0_7 = arith.constant 0 : index
    %c0_8 = arith.constant 0 : index
    %16 = vector.load %arg3[%c0_7, %c0_8] : memref<32x1xf32, #tpu.memory_space<vmem>>, vector<32x1xf32>
    %17 = vector.broadcast %14 : vector<32x1xf32> to vector<32x512xf32>
    %18 = arith.mulf %1, %17 : vector<32x512xf32>
    %19 = vector.broadcast %15 : vector<32x1xf32> to vector<32x512xf32>
    %20 = arith.mulf %19, %18 : vector<32x512xf32>
    %21 = vector.broadcast %16 : vector<32x1xf32> to vector<32x512xf32>
    %22 = arith.addf %20, %21 : vector<32x512xf32>
    %23 = arith.addf %22, %1 : vector<32x512xf32>
    %c0_9 = arith.constant 0 : index
    %c0_10 = arith.constant 0 : index
    %c0_11 = arith.constant 0 : index
    %24 = vector.load %arg4[%c0_9, %c0_10, %c0_11] : memref<1x32x512xf32, #tpu.memory_space<vmem>>, vector<1x32x512xf32>
    %25 = vector.shape_cast %24 : vector<1x32x512xf32> to vector<32x512xf32>
    %26 = vector.shape_cast %23 : vector<32x512xf32> to vector<1x32x512xf32>
    tpu.vector_store %arg4[%c0_9, %c0_10, %c0_11], %26 {strides = array<i32>} : memref<1x32x512xf32, #tpu.memory_space<vmem>>, vector<1x32x512xf32>,
    return
  }
  func.func @transform_0(%arg0: i32) -> (i32, i32, i32) {
    %c0_i32 = arith.constant 0 : i32
    %c0_i32_0 = arith.constant 0 : i32
    %c0_i32_1 = arith.constant 0 : i32
    return %arg0, %c0_i32, %c0_i32_0 : i32, i32, i32
  }
  func.func @transform_1(%arg0: i32) -> (i32, i32) {
    %c0_i32 = arith.constant 0 : i32
    %c0_i32_0 = arith.constant 0 : i32
    %c0_i32_1 = arith.constant 0 : i32
    return %c0_i32, %c0_i32_0 : i32, i32
  }
  func.func @transform_2(%arg0: i32) -> (i32, i32) {
    %c0_i32 = arith.constant 0 : i32
    %c0_i32_0 = arith.constant 0 : i32
    %c0_i32_1 = arith.constant 0 : i32
    return %c0_i32, %c0_i32_0 : i32, i32
  }
  func.func @transform_3(%arg0: i32) -> (i32, i32, i32) {
    %c0_i32 = arith.constant 0 : i32
    %c0_i32_0 = arith.constant 0 : i32
    %c0_i32_1 = arith.constant 0 : i32
    return %arg0, %c0_i32, %c0_i32_0 : i32, i32, i32
  }
}

</mosaic_0001>

<bundles_post_ra>
// kernel: tpu_custom_call.1
= control target key start
LH: loop header
LB: loop body
LE: loop exit
PB: predicated region body
PF: predicated region fallthrough
CT: control target
= control target key end

     0   :  { %8 = vsyncpa [#allocation3], 0  ;;  %s1022_s0 = inlined_call_operand.hbm [shape: f32[2,32,512], index: 0, kind: input, shape index: {}]   ;;  %s1023_s1 = inlined_call_operand.vmem [shape: f32[32,1], index: 1, kind: input, shape index: {}]   ;;  %s1024_s2 = inlined_call_operand.vmem [shape: f32[32,1], index: 2, kind: input, shape index: {}]   ;;  %s1025_s3 = inlined_call_operand.hbm [shape: f32[2,32,512], index: 3, kind: output, shape index: {}]  }
   0x1   :  { %10 = vsyncpa [#allocation3 + $0x1], 0 }
   0x2   :  { %11 = vsyncpa [#allocation4], 0 }
   0x3   :  { %13 = vsyncpa [#allocation4 + $0x1], 0  ;;  %s701_s12 = smov 0   ;;  %s703_s13 = smov 0  }
   0x4   :  { %s705_s14 = smov 0   ;;  %s707_s15 = smov 0  }
   0x5 LB: > { %s722_s16 = sadd.s32 4294967295, %s672_s15   ;;  %s501_s17 = sadd.s32 4294967294, %s672_s15   ;;  %s672_s15 = sphi %s707_s15, %s1040_s15   ;;  %s668_s14 = sphi %s705_s14, %s1039_s14   ;;  %s664_s13 = sphi %s703_s13, %s1038_s13   ;;  %s660_s12 = sphi %s701_s12, %s1037_s12  }
   0x6   : > { %s726_s18 = sadd.s32 1, %s672_s15   ;;  %s26_s19 = sadd.s32 1, %s668_s14 }
   0x7   : > { %s23_s20 = ssub.s32 %s672_s15, %s726_s18  ;;  %p33_p0 = scmp.ne.s32.totalorder %s668_s14, %s664_s13 }
   0x8   : > { %p24_p1 = scmp.eq.s32.totalorder %s23_s20, 0  ;;  %p34_p2 = scmp.eq.s32.totalorder %s672_s15, 0 }
   0x9   : > { %p39_p3 = scmp.ne.s32.totalorder %s664_s13, %s660_s12  ;;  %p40_p4 = scmp.eq.s32.totalorder %s722_s16, 0 }
   0xa   : > { %s738_s21 = scalar_select %p24_p1, %s668_s14, %s26_s19  }
   0xb   : > { %p740_p5 = por %p34_p2, %p33_p0  ;;  %p744_p6 = por %p40_p4, %p39_p3 }
   0xc   : > { %p105_p7 = scmp.eq.s32.totalorder %s722_s16, 1  ;;  %p111_p8 = scmp.eq.s32.totalorder %s501_s17, 1 }
   0xd   : > { %s1029_s23 = scalar_select %p744_p6, 1, 0 }
   0xe   : > { %p529_p10 = scmp.lt.s32.totalorder %s672_s15, 2  ;;  %p751_p11 = por %p105_p7, %p33_p0 }
   0xf   : > { %p755_p12 = por %p111_p8, %p39_p3  ;;  %s137_s26 = sand.u32 1, %s668_s14  }
  0x10   : > { %s1030_s24 = scalar_select %p751_p11, 1, 0 }
  0x11   : > { %s1031_s25 = scalar_select %p755_p12, 1, 0 }
  0x12   : > { %s515_s27 = sshll.u32 %s672_s15, 11  ;;  %s504_s28 = sshll.u32 %s137_s26, 7 }
  0x13   : > { %s764_s4 = scalar_lea.hbm %s1022_s0, %s515_s27  ;;  %s141_s5 = scalar_lea.vmem [#allocation2], %s504_s28 }
  0x14   : > { %s148_s6 = sshll.u32 %s141_s5, 4  ;;  %p768_p13 = pnand %p529_p10, %p740_p5  ;;  %s772_s6 = int_to_ptr.vmem [resolvable:$true] %s148_s6 }
  0x15   : > { %s774_s8 = scalar_lea.sflag [#allocation3], %s137_s26  ;;  %s580_s9 = scalar_lea.hbm %s764_s4, 2048 }
  0x16   : > { %p581_p0 = scmp.ne.s32.totalorder %s764_s4, %s580_s9  ;;  %p582_p1 = pneg %p768_p13 }
  0x17   : > { %s585_s17 = scalar_lea.hbm %s1022_s0, 4096  ;;  %p586_p4 = scmp.lt.s32.totalorder %s764_s4, %s1022_s0 }
  0x18   : > { %p583_p2 = pnand %p582_p1, %p581_p0  ;;  %p587_p5 = scmp.lt.s32.totalorder %s585_s17, %s580_s9 }
  0x1a   : > { %p584_p3 = pneg %p583_p2  ;;  %p588_p7 = por %p587_p5, %p586_p4 }
  0x1c   : > { %p589_p8 = pnand %p588_p7, %p584_p3 }
  0x1e   : > { %592 = shalt.err (!%p589_p8)
}
  0x1f   : > { %s593_s22 = scalar_lea.vmem %s772_s6, 2048  ;;  %s674_s26 = smov [#allocation2]  }
  0x20   : > { %p594_p10 = scmp.ne.s32.totalorder %s772_s6, %s593_s22  ;;  %s598_s27 = sshll.u32 %s674_s26, 4  ;;  %s599_s27 = int_to_ptr.vmem [resolvable:$false] %s598_s27 }
  0x21   : > { %s600_s28 = scalar_lea.vmem %s599_s27, 4096  ;;  %p601_p2 = scmp.lt.s32.totalorder %s772_s6, %s599_s27 }
  0x22   : > { %p596_p9 = pnand %p594_p10, %p582_p1  ;;  %p602_p12 = scmp.lt.s32.totalorder %s600_s28, %s593_s22 }
  0x24   : > { %p597_p0 = pneg %p596_p9  ;;  %p603_p11 = por %p602_p12, %p601_p2 }
  0x26   : > { %p604_p6 = pnand %p603_p11, %p597_p0 }
  0x28   : > { %607 = shalt.err (!%p604_p6)
}
  0x29   : > { %s675_s29 = smov 512   ;;  %s676_s30 = smov 32  }
  0x2a   : > { %524 = dma.hbm_to_vmem [thread:$0]  (!%p768_p13), %s764_s4, 2048, %s772_s6, %s774_s8, %s675_s29, %s675_s29, %s676_s30  }
  0x2b   : > { %p507_p9 = scmp.ge.s32.totalorder %s672_s15, 1  ;;  %p156_p1 = scmp.lt.s32.totalorder %s672_s15, 3 }
  0x2d   : > { %p157_p3 = pnand %p507_p9, %p156_p1 }
  0x2e   : > { %s798_s5 = sand.u32 (!%p157_p3), 1, %s664_s13   ;;  %p1033_p6 = scmp.ne.s32.totalorder (!%p157_p3), %s1029_s23, 0 }
  0x2f   : > { %160 = sbr.rel (%p157_p3) target bundleno = 296 (0x128), region = 32  ;;  %s508_s9 = sshll.u32 (!%p157_p3), %s798_s5, 7 }
  0x30   : > { %s163_s10 = scalar_lea.sflag (!%p157_p3), [#allocation3], %s798_s5  ;;  %s804_s11 = scalar_lea.vmem (!%p157_p3), [#allocation2], %s508_s9 }
  0x34   : > { %651 = dma.done.wait (%p1033_p6), %s163_s10, 2048  }
  0x35   : > { %653 = vsyncadd (%p1033_p6), %s163_s10, 4294965248  ;;  %v677_v0 = vmov 0   ;;  %v811_v1 = vld [vmem:[%s804_s11 + $0x40] sm:$0xff]  ;;  %v814_v2 = vld [vmem:[%s804_s11 + $0x48] sm:$0xff]  ;;  %s934_s23 = scalar_lea.vmem [#allocation5], %s508_s9  ;;  %s516_s9 = sshll.u32 %s722_s16, 11 }
  0x36   : > { %569 = vset.pattern.permute.xlu1 %v677_v0  ;;  %568 = vset.pattern.permute.xlu0 %v677_v0  ;;  %v817_v3 = vld [vmem:[%s804_s11 + $0x50] sm:$0xff]  ;;  %v820_v4 = vld [vmem:[%s804_s11 + $0x58] sm:$0xff]  ;;  %v213_v5 = vmul.f32 %v811_v1, %v811_v1  ;;  %v214_v6 = vmul.f32 %v814_v2, %v814_v2  ;;  %v829_v8 = vld [vmem:[%s804_s11] sm:$0xff]  ;;  %s428_s4 = sshll.u32 %s934_s23, 4  ;;  %s965_s7 = scalar_lea.hbm %s1025_s3, %s516_s9  ;;  %s967_s4 = int_to_ptr.vmem [resolvable:$true] %s428_s4 }
  0x37   : > { %v215_v7 = vmul.f32 %v817_v3, %v817_v3  ;;  %v832_v9 = vld [vmem:[%s804_s11 + $0x8] sm:$0xff]  ;;  %v835_v10 = vld [vmem:[%s804_s11 + $0x10] sm:$0xff]  ;;  %v838_v11 = vld [vmem:[%s804_s11 + $0x18] sm:$0xff]  ;;  %v205_v12 = vmul.f32 %v829_v8, %v829_v8  ;;  %v216_v15 = vmul.f32 %v820_v4, %v820_v4  ;;  %s415_s8 = scalar_lea.sflag [#allocation4], %s798_s5  ;;  %s608_s17 = scalar_lea.vmem %s967_s4, 2048 }
  0x38   : > { %v206_v13 = vmul.f32 %v832_v9, %v832_v9  ;;  %v845_v14 = vld [vmem:[%s804_s11 + $0x60] sm:$0xff]  ;;  %v231_v16 = vadd.f32 %v214_v6, %v213_v5  ;;  %v207_v17 = vmul.f32 %v835_v10, %v835_v10  ;;  %v852_v18 = vld [vmem:[%s804_s11 + $0x68] sm:$0xff]  ;;  %v855_v19 = vld [vmem:[%s804_s11 + $0x70] sm:$0xff]  ;;  %v208_v22 = vmul.f32 %v838_v11, %v838_v11  ;;  %p609_p11 = scmp.ne.s32.totalorder %s967_s4, %s608_s17  ;;  %p1034_p12 = scmp.ne.s32.totalorder %s1030_s24, 0 }
  0x39   : > { %v858_v20 = vld [vmem:[%s804_s11 + $0x78] sm:$0xff]  ;;  %v217_v21 = vmul.f32 %v845_v14, %v845_v14  ;;  %v218_v24 = vmul.f32 %v852_v18, %v852_v18  ;;  %v219_v25 = vmul.f32 %v855_v19, %v855_v19  ;;  %v869_v26 = vld [vmem:[%s804_s11 + $0x20] sm:$0xff]  ;;  %v872_v27 = vld [vmem:[%s804_s11 + $0x28] sm:$0xff]  ;;  %s678_s19 = smov [#allocation5]  }
  0x3a   : > { %v221_v23 = vadd.f32 %v206_v13, %v205_v12  ;;  %v875_v28 = vld [vmem:[%s804_s11 + $0x30] sm:$0xff]  ;;  %v232_v29 = vadd.f32 %v231_v16, %v215_v7  ;;  %v878_v30 = vld [vmem:[%s804_s11 + $0x38] sm:$0xff]  ;;  %v209_v31 = vmul.f32 %v869_v26, %v869_v26  ;;  %v210_v32 = vmul.f32 %v872_v27, %v872_v27  ;;  %v287_v45 = vld [vmem:[%s1023_s1 + $0x8] sm:$0xff]  ;;  %p610_p13 = pnand %p609_p11, %p1034_p12  ;;  %s612_s20 = sshll.u32 %s678_s19, 4  ;;  %s613_s20 = int_to_ptr.vmem [resolvable:$false] %s612_s20 }
  0x3b   : > { %v211_v33 = vmul.f32 %v875_v28, %v875_v28  ;;  %v220_v35 = vmul.f32 %v858_v20, %v858_v20  ;;  %v236_v36 = vadd.f32 %v218_v24, %v217_v21  ;;  %v212_v38 = vmul.f32 %v878_v30, %v878_v30  ;;  %v288_v46 = vld [vmem:[%s1023_s1 + $0x10] sm:$0xff]  ;;  %v286_v47 = vld [vmem:[%s1023_s1] sm:$0xff]  ;;  %v289_v48 = vld [vmem:[%s1023_s1 + $0x18] sm:$0xff]  ;;  %s614_s22 = scalar_lea.vmem %s613_s20, 4096  ;;  %p615_p5 = scmp.lt.s32.totalorder %s967_s4, %s613_s20 }
  0x3c   : > { %v222_v34 = vadd.f32 %v221_v23, %v207_v17  ;;  %v233_v37 = vadd.f32 %v232_v29, %v216_v15  ;;  %v226_v39 = vadd.f32 %v210_v32, %v209_v31  ;;  %v290_v49 = vld [vmem:[%s1024_s2] sm:$0xff]  ;;  %v291_v50 = vld [vmem:[%s1024_s2 + $0x8] sm:$0xff]  ;;  %v292_v51 = vld [vmem:[%s1024_s2 + $0x10] sm:$0xff]  ;;  %p611_p4 = pneg %p610_p13  ;;  %p616_p7 = scmp.lt.s32.totalorder %s614_s22, %s608_s17 }
  0x3d   : > { %v237_v41 = vadd.f32 %v236_v36, %v219_v25  ;;  %v293_v52 = vld [vmem:[%s1024_s2 + $0x18] sm:$0xff] }
  0x3e   : > { %v223_v40 = vadd.f32 %v222_v34, %v208_v22  ;;  %234 = vadd.xlane.f32.xlu1 %v233_v37  ;;  %v227_v42 = vadd.f32 %v226_v39, %v211_v33  ;;  %p617_p8 = por %p616_p7, %p615_p5 }
  0x3f   : > { %v238_v43 = vadd.f32 %v237_v41, %v220_v35 }
  0x40   : > { %224 = vadd.xlane.f32.xlu0 %v223_v40  ;;  %v228_v44 = vadd.f32 %v227_v42, %v212_v38  ;;  %p618_p10 = pnand %p617_p8, %p611_p4 }
  0x42   : > { %239 = vadd.xlane.f32.xlu1 %v238_v43 }
  0x44   : > { %229 = vadd.xlane.f32.xlu0 %v228_v44 }
  0x53   : > { %317 = vperm.xlu1 %569, %v287_v45  }
  0x57   : > { %322 = vperm.xlu1 %569, %v288_v46  }
  0x5a   : > { %312 = vperm.xlu0 %568, %v286_v47  }
  0x5b   : > { %327 = vperm.xlu1 %569, %v289_v48  }
  0x5f   : > { %348 = vperm.xlu1 %569, %v290_v49  }
  0x63   : > { %353 = vperm.xlu1 %569, %v291_v50  }
  0x67   : > { %358 = vperm.xlu1 %569, %v292_v51  }
  0x6b   : > { %363 = vperm.xlu1 %569, %v293_v52  }
  0xc7   : > { %v235_v53 = vpop.xlane.xlu1 %234 }
  0xc8   : > { %570 = vrsqrt.f32 %v235_v53  ;;  %vm257_vm1 = vcmp.eq.f32.partialorder %v235_v53, inf  ;;  %v260_v15 = vand.u32 2147483648, %v235_v53  ;;  %vm259_vm6 = vcmp.eq.f32.partialorder %v235_v53, 0.0 }
  0xc9   : > { %v225_v54 = vpop.xlane.xlu0 %224 }
  0xca   : > { %572 = vrsqrt.f32 %v225_v54  ;;  %vm243_vm0 = vcmp.eq.f32.partialorder %v225_v54, inf  ;;  %v246_v6 = vand.u32 2147483648, %v225_v54  ;;  %vm245_vm3 = vcmp.eq.f32.partialorder %v225_v54, 0.0 }
  0xcb   : > { %v240_v55 = vpop.xlane.xlu1 %239 }
  0xcc   : > { %574 = vrsqrt.f32 %v240_v55  ;;  %vm264_vm5 = vcmp.eq.f32.partialorder %v240_v55, inf  ;;  %v267_v24 = vand.u32 2147483648, %v240_v55  ;;  %vm266_vm7 = vcmp.eq.f32.partialorder %v240_v55, 0.0 }
  0xcd   : > { %v230_v56 = vpop.xlane.xlu0 %229 }
  0xce   : > { %576 = vrsqrt.f32 %v230_v56  ;;  %vm250_vm2 = vcmp.eq.f32.partialorder %v230_v56, inf  ;;  %v253_v7 = vand.u32 2147483648, %v230_v56  ;;  %vm252_vm4 = vcmp.eq.f32.partialorder %v230_v56, 0.0 }
  0xcf   : > { %v318_v36 = vpop.permute.xlu1 %317 }
  0xd3   : > { %v323_v40 = vpop.permute.xlu1 %322 }
  0xd5   : > { %v571_v57 = vpop.eup %570 }
  0xd6   : > { %v256_v61 = vmul.f32 %v571_v57, %v235_v53 }
  0xd7   : > { %v573_v58 = vpop.eup %572  ;;  %v328_v42 = vpop.permute.xlu1 %327 }
  0xd8   : > { %v242_v59 = vmul.f32 %v573_v58, %v225_v54  ;;  %v258_v12 = vsel %vm257_vm1, %v235_v53, %v256_v61 }
  0xd9   : > { %v575_v60 = vpop.eup %574  ;;  %v261_v23 = vsel %vm259_vm6, %v260_v15, %v258_v12 }
  0xda   : > { %v244_v63 = vsel %vm243_vm0, %v225_v54, %v242_v59  ;;  %v263_v0 = vmul.f32 %v575_v60, %v240_v55 }
  0xdb   : > { %v577_v62 = vpop.eup %576  ;;  %v247_v16 = vsel %vm245_vm3, %v246_v6, %v244_v63  ;;  %v914_v43 = vpop.permute.xlu1 %348 }
  0xdc   : > { %v249_v5 = vmul.f32 %v577_v62, %v230_v56  ;;  %v265_v21 = vsel %vm264_vm5, %v240_v55, %v263_v0 }
  0xdd   : > { %v268_v29 = vsel %vm266_vm7, %v267_v24, %v265_v21 }
  0xde   : > { %v251_v13 = vsel %vm250_vm2, %v230_v56, %v249_v5 }
  0xdf   : > { %v254_v17 = vsel %vm252_vm4, %v253_v7, %v251_v13  ;;  %v354_v47 = vpop.permute.xlu1 %353 }
  0xe0   : > { %v269_v22 = vadd.f32 %v254_v17, %v247_v16 }
  0xe2   : > { %v270_v25 = vadd.f32 %v269_v22, %v261_v23 }
  0xe3   : > { %v359_v15 = vpop.permute.xlu1 %358 }
  0xe4   : > { %v271_v31 = vadd.f32 %v270_v25, %v268_v29 }
  0xe6   : > { %v272_v32 = vrot.slane %v271_v31, 4 }
  0xe8   : > { %v273_v33 = vadd.f32 %v272_v32, %v271_v31 }
  0xea   : > { %v274_v34 = vrot.slane %v273_v33, 2 }
  0xec   : > { %v275_v35 = vadd.f32 %v274_v34, %v273_v33 }
  0xee   : > { %v276_v37 = vrot.slane %v275_v35, 1 }
  0xf0   : > { %v277_v38 = vadd.f32 %v276_v37, %v275_v35 }
  0xf2   : > { %v279_v39 = vmul.f32 0.03125, %v277_v38 }
  0xf4   : > { %v280_v41 = vadd.f32 1e-06, %v279_v39 }
  0xf6   : > { %578 = vrcp.f32 %v280_v41 }
 0x103   : > { %v579_v44 = vpop.eup %578 }
 0x104   : > { %v283_v45 = vmul.f32 %v579_v44, %v254_v17  ;;  %v284_v46 = vmul.f32 %v579_v44, %v261_v23  ;;  %v285_v48 = vmul.f32 %v579_v44, %v268_v29  ;;  %v282_v49 = vmul.f32 %v579_v44, %v247_v16 }
 0x106   : > { %v298_v50 = vmul.f32 %v283_v45, %v869_v26  ;;  %v299_v51 = vmul.f32 %v283_v45, %v872_v27  ;;  %v300_v52 = vmul.f32 %v283_v45, %v875_v28  ;;  %v301_v53 = vmul.f32 %v283_v45, %v878_v30 }
 0x107   : > { %v302_v54 = vmul.f32 %v284_v46, %v811_v1  ;;  %v303_v55 = vmul.f32 %v284_v46, %v814_v2  ;;  %v304_v56 = vmul.f32 %v284_v46, %v817_v3  ;;  %v305_v57 = vmul.f32 %v284_v46, %v820_v4 }
 0x108   : > { %v334_v58 = vmul.f32 %v318_v36, %v298_v50  ;;  %v335_v59 = vmul.f32 %v318_v36, %v299_v51  ;;  %v336_v60 = vmul.f32 %v318_v36, %v300_v52  ;;  %v337_v61 = vmul.f32 %v318_v36, %v301_v53 }
 0x109   : > { %v338_v62 = vmul.f32 %v323_v40, %v302_v54  ;;  %v339_v63 = vmul.f32 %v323_v40, %v303_v55  ;;  %v340_v0 = vmul.f32 %v323_v40, %v304_v56  ;;  %v341_v5 = vmul.f32 %v323_v40, %v305_v57  ;;  %v364_v40 = vpop.permute.xlu1 %363 }
 0x10a   : > { %v370_v6 = vadd.f32 %v354_v47, %v334_v58  ;;  %v371_v7 = vadd.f32 %v354_v47, %v335_v59  ;;  %v372_v12 = vadd.f32 %v354_v47, %v336_v60  ;;  %v373_v13 = vadd.f32 %v354_v47, %v337_v61 }
 0x10b   : > { %v374_v16 = vadd.f32 %v359_v15, %v338_v62  ;;  %v375_v17 = vadd.f32 %v359_v15, %v339_v63  ;;  %v376_v21 = vadd.f32 %v359_v15, %v340_v0  ;;  %v377_v22 = vadd.f32 %v359_v15, %v341_v5 }
 0x10c   : > { %v386_v23 = vadd.f32 %v370_v6, %v869_v26  ;;  %v387_v24 = vadd.f32 %v371_v7, %v872_v27  ;;  %v388_v25 = vadd.f32 %v372_v12, %v875_v28  ;;  %v389_v29 = vadd.f32 %v373_v13, %v878_v30  ;;  %v313_v26 = vpop.permute.xlu0 %312 }
 0x10d   : > { %v390_v31 = vadd.f32 %v374_v16, %v811_v1  ;;  %v391_v32 = vadd.f32 %v375_v17, %v814_v2  ;;  %v392_v33 = vadd.f32 %v376_v21, %v817_v3  ;;  %v393_v34 = vadd.f32 %v377_v22, %v820_v4 }
 0x10e   : > { %402 = vst [vmem:[%s934_s23 + $0x20] sm:$0xff] %v386_v23  ;;  %403 = vst [vmem:[%s934_s23 + $0x28] sm:$0xff] %v387_v24  ;;  %v306_v1 = vmul.f32 %v285_v48, %v845_v14  ;;  %v307_v2 = vmul.f32 %v285_v48, %v852_v18  ;;  %v308_v3 = vmul.f32 %v285_v48, %v855_v19 }
 0x10f   : > { %404 = vst [vmem:[%s934_s23 + $0x30] sm:$0xff] %v388_v25  ;;  %405 = vst [vmem:[%s934_s23 + $0x38] sm:$0xff] %v389_v29  ;;  %v309_v4 = vmul.f32 %v285_v48, %v858_v20  ;;  %v294_v27 = vmul.f32 %v282_v49, %v829_v8  ;;  %v295_v28 = vmul.f32 %v282_v49, %v832_v9 }
 0x110   : > { %406 = vst [vmem:[%s934_s23 + $0x40] sm:$0xff] %v390_v31  ;;  %407 = vst [vmem:[%s934_s23 + $0x48] sm:$0xff] %v391_v32  ;;  %v296_v30 = vmul.f32 %v282_v49, %v835_v10  ;;  %v297_v35 = vmul.f32 %v282_v49, %v838_v11  ;;  %v342_v36 = vmul.f32 %v328_v42, %v306_v1 }
 0x111   : > { %408 = vst [vmem:[%s934_s23 + $0x50] sm:$0xff] %v392_v33  ;;  %409 = vst [vmem:[%s934_s23 + $0x58] sm:$0xff] %v393_v34  ;;  %v343_v37 = vmul.f32 %v328_v42, %v307_v2  ;;  %v344_v38 = vmul.f32 %v328_v42, %v308_v3  ;;  %v345_v39 = vmul.f32 %v328_v42, %v309_v4 }
 0x112   : > { %v330_v41 = vmul.f32 %v313_v26, %v294_v27  ;;  %v331_v44 = vmul.f32 %v313_v26, %v295_v28  ;;  %v332_v45 = vmul.f32 %v313_v26, %v296_v30  ;;  %v333_v46 = vmul.f32 %v313_v26, %v297_v35 }
 0x113   : > { %v378_v47 = vadd.f32 %v364_v40, %v342_v36  ;;  %v379_v48 = vadd.f32 %v364_v40, %v343_v37  ;;  %v380_v50 = vadd.f32 %v364_v40, %v344_v38  ;;  %v381_v51 = vadd.f32 %v364_v40, %v345_v39 }
 0x114   : > { %v366_v52 = vadd.f32 %v914_v43, %v330_v41  ;;  %v367_v49 = vadd.f32 %v914_v43, %v331_v44  ;;  %v368_v42 = vadd.f32 %v914_v43, %v332_v45  ;;  %v369_v53 = vadd.f32 %v914_v43, %v333_v46 }
 0x115   : > { %v394_v54 = vadd.f32 %v378_v47, %v845_v14  ;;  %v395_v55 = vadd.f32 %v379_v48, %v852_v18  ;;  %v396_v56 = vadd.f32 %v380_v50, %v855_v19  ;;  %v397_v57 = vadd.f32 %v381_v51, %v858_v20 }
 0x116   : > { %v382_v14 = vadd.f32 %v366_v52, %v829_v8  ;;  %v383_v18 = vadd.f32 %v367_v49, %v832_v9  ;;  %v384_v43 = vadd.f32 %v368_v42, %v835_v10  ;;  %v385_v19 = vadd.f32 %v369_v53, %v838_v11 }
 0x117   : > { %410 = vst [vmem:[%s934_s23 + $0x60] sm:$0xff] %v394_v54  ;;  %411 = vst [vmem:[%s934_s23 + $0x68] sm:$0xff] %v395_v55 }
 0x118   : > { %412 = vst [vmem:[%s934_s23 + $0x70] sm:$0xff] %v396_v56  ;;  %413 = vst [vmem:[%s934_s23 + $0x78] sm:$0xff] %v397_v57 }
 0x119   : > { %398 = vst [vmem:[%s934_s23] sm:$0xff] %v382_v14  ;;  %399 = vst [vmem:[%s934_s23 + $0x8] sm:$0xff] %v383_v18 }
 0x11a   : > { %400 = vst [vmem:[%s934_s23 + $0x10] sm:$0xff] %v384_v43  ;;  %401 = vst [vmem:[%s934_s23 + $0x18] sm:$0xff] %v385_v19 }
 0x11b   : > { %621 = shalt.err (!%p618_p10)
}
 0x11c   : > { %s622_s26 = scalar_lea.hbm %s965_s7, 2048  ;;  %s626_s29 = scalar_lea.hbm %s1025_s3, 4096 }
 0x11d   : > { %p623_p0 = scmp.ne.s32.totalorder %s965_s7, %s622_s26  ;;  %p627_p1 = scmp.lt.s32.totalorder %s965_s7, %s1025_s3 }
 0x11e   : > { %p628_p3 = scmp.lt.s32.totalorder %s626_s29, %s622_s26 }
 0x11f   : > { %p624_p2 = pnand %p623_p0, %p1034_p12 }
 0x120   : > { %p629_p6 = por %p628_p3, %p627_p1 }
 0x121   : > { %p625_p9 = pneg %p624_p2 }
 0x123   : > { %p630_p11 = pnand %p629_p6, %p625_p9 }
 0x125   : > { %633 = shalt.err (!%p630_p11)
}
 0x126   : > { %s679_s11 = smov 512   ;;  %s680_s23 = smov 32  }
 0x127   : > { %519 = dma.vmem_to_hbm [thread:$0]  (%p1034_p12), %s967_s4, 2048, %s965_s7, %s415_s8, %s679_s11, %s679_s11, %s680_s23  }
 0x128 PF: > { %s443_s9 = sand.u32 1, %s660_s12   ;;  %p1035_p13 = scmp.ne.s32.totalorder %s1031_s25, 0 }
 0x129   : > { %p1036_p4 = scmp.ge.s32.totalorder %s672_s15, 2  ;;  %s444_s16 = scalar_lea.sflag [#allocation4], %s443_s9 }
 0x12b   : > { %p526_p5 = pnand %p1036_p4, %p1035_p13 }
 0x12d   : > { %p527_p7 = pneg %p526_p5 }
 0x12f   : > { %655 = dma.done.wait (%p527_p7), %s444_s16, 2048  }
 0x130   : > { %657 = vsyncadd (%p527_p7), %s444_s16, 4294965248  ;;  %p16_p8 = scmp.ge.s32.totalorder %s726_s18, 4   ;;  %s1037_s12 = smov %s664_s13 }
 0x131   : > { %s1038_s13 = smov %s668_s14  ;;  %s1039_s14 = smov %s738_s21 }
 0x132   : > { %s1040_s15 = smov %s726_s18  ;;  %18 = sbr.rel (!%p16_p8) target bundleno = 5 (0x5), region = 77 }
 0x137   :  { %449 = vsyncpa [#allocation3], 1 }
 0x138   :  { %451 = vsyncpa [#allocation3 + $0x1], 1 }
 0x139   :  { %452 = vsyncpa [#allocation4], 1 }
 0x13a   :  { %454 = vsyncpa [#allocation4 + $0x1], 1 }

</bundles_post_ra>
